<compile_context>
chip_gen: v6e
topology: v6e:2x2x1
jax: 0.10.0
libtpu: 0.0.40
codegen_flags: <defaults>
</compile_context>

<pallas_src>
import functools

import jax
import jax.numpy as jnp
from jax.experimental import pallas as pl
from jax.experimental.pallas import tpu as pltpu


def _round_up(x, m):
    return (x + m - 1) // m * m


def _sublane_multiple(dtype):
    # Minimum second-minor layout tile for this dtype: 8 f32 / 16 bf16 / 32 int8.
    return max(8, 32 // jnp.dtype(dtype).itemsize)


def _padded_block_bytes(shape, dtype):
    """VMEM footprint of one block after (sublane, lane) layout padding."""
    itemsize = jnp.dtype(dtype).itemsize
    sub = _sublane_multiple(dtype)
    dims = list(shape)
    dims[-1] = _round_up(dims[-1], 128)
    if len(dims) >= 2:
        dims[-2] = _round_up(dims[-2], sub)
    n = 1
    for d in dims:
        n *= d
    return n * itemsize


# --------------------------------------------------------------------------
# Kernels
# --------------------------------------------------------------------------
def _gap_direct_kernel(x_ref, o_ref, *, inv_hw):
    """Full spatial extent in one block: x (b_blk, c_blk, HW) -> o (b_blk, c_blk)."""
    # f32 accumulation of the lane reduction without materializing an f32 copy.
    # TODO(synk): if the XLU lane-reduce ever binds on v7x, switch to an MXU
    # reduction (dot of the tile against a ones(HW, 1) vector).
    s = jnp.sum(x_ref[...], axis=-1, dtype=jnp.float32)
    o_ref[...] = (s * inv_hw).astype(o_ref.dtype)


def _gap_tiled_kernel(x_ref, o_ref, acc_ref, *, inv_hw, hw, hw_tile, mask_tail):
    """HW-tiled fallback: x (b_blk, C, hw_tile) with a resident f32 accumulator."""
    k = pl.program_id(1)
    x = x_ref[...]
    if mask_tail:
        # The trailing HW block reads past the true extent; zero the garbage
        # lanes so they never pollute real outputs.
        pos = k * hw_tile + jax.lax.broadcasted_iota(jnp.int32, x.shape, x.ndim - 1)
        x = jnp.where(pos < hw, x, jnp.zeros_like(x))
    psum = jnp.sum(x, axis=-1, dtype=jnp.float32)

    @pl.when(k == 0)
    def _():
        acc_ref[...] = psum          # first tile writes: no separate zero-fill

    @pl.when(k > 0)
    def _():
        acc_ref[...] += psum

    @pl.when(k == pl.num_programs(1) - 1)
    def _():
        o_ref[...] = (acc_ref[...] * inv_hw).astype(o_ref.dtype)


# --------------------------------------------------------------------------
# Tiling plan
# --------------------------------------------------------------------------
def _choose_plan(B, C, HW, dtype, vmem_target_bytes):
    itemsize = jnp.dtype(dtype).itemsize
    sub = _sublane_multiple(dtype)
    b_min = B if B <= sub else sub          # smallest legal batch block

    def in_bytes(b_blk, c_blk, hw_blk):
        # Layout-padded VMEM bytes of one input block.
        return b_blk * _round_up(c_blk, sub) * _round_up(hw_blk, 128) * itemsize

    # ---- Preferred: full-HW blocks, all-parallel (batch, channel) grid. ----
    c_candidates = [C]
    if C > 128:
        # Channel splits must be multiples of 128 (output lane constraint).
        c_candidates += [c for c in (512, 256, 128) if c < C]
    for c_blk in c_candidates:
        if in_bytes(b_min, c_blk, HW) > vmem_target_bytes:
            continue
        b_blk = vmem_target_bytes // in_bytes(1, c_blk, HW)
        if b_blk >= B:
            b_blk = B
            if B > 2 * sub:
                # Keep >= 2 batch blocks so both v7x TensorCores get work.
                b_blk = _round_up(pl.cdiv(B, 2), sub)
        else:
            b_blk = max(b_min, (b_blk // sub) * sub)
        return {"mode": "direct", "b_blk": int(b_blk), "c_blk": int(c_blk)}

    # ---- Fallback: tile the spatial (reduction) axis. ----
    b_blk = b_min
    bytes_per_hw_lane = b_blk * _round_up(C, sub) * itemsize
    hw_tile = (vmem_target_bytes // bytes_per_hw_lane) // 128 * 128
    hw_tile = max(128, hw_tile)
    hw_tile = min(hw_tile, _round_up(HW, 128))
    return {"mode": "tiled", "b_blk": int(b_blk), "hw_tile": int(hw_tile)}


# --------------------------------------------------------------------------
# Wrapper
# --------------------------------------------------------------------------
def global_avg_pool_2d(x, *, vmem_target_bytes=12 * 1024 * 1024):
    """x: (B, C, H, W) -> (B, C), averaging over H and W."""
    B, C, H, W = x.shape
    HW = H * W
    x_flat = x.reshape(B, C, HW)            # contiguous collapse; no data movement
    inv_hw = float(1.0 / HW)
    plan = _choose_plan(B, C, HW, x.dtype, vmem_target_bytes)

    headroom = 4 * 1024 * 1024              # compiler-internal scratch margin

    if plan["mode"] == "direct":
        b_blk, c_blk = plan["b_blk"], plan["c_blk"]
        grid = (pl.cdiv(B, b_blk), pl.cdiv(C, c_blk))
        in_b = _padded_block_bytes((b_blk, c_blk, HW), x.dtype)
        out_b = _padded_block_bytes((b_blk, c_blk), x.dtype)
        need = 2 * in_b + 2 * out_b + headroom
        kernel = functools.partial(_gap_direct_kernel, inv_hw=inv_hw)
        grid_spec = pltpu.PrefetchScalarGridSpec(
            num_scalar_prefetch=0,
            grid=grid,
            in_specs=[pl.BlockSpec((b_blk, c_blk, HW), lambda b, c: (b, c, 0))],
            out_specs=pl.BlockSpec((b_blk, c_blk), lambda b, c: (b, c)),
        )
        dim_sem = ("parallel", "parallel")
    else:
        b_blk, hw_tile = plan["b_blk"], plan["hw_tile"]
        grid = (pl.cdiv(B, b_blk), pl.cdiv(HW, hw_tile))
        in_b = _padded_block_bytes((b_blk, C, hw_tile), x.dtype)
        out_b = _padded_block_bytes((b_blk, C), x.dtype)
        acc_b = _padded_block_bytes((b_blk, C), jnp.float32)
        need = 2 * in_b + 2 * out_b + acc_b + headroom
        kernel = functools.partial(
            _gap_tiled_kernel, inv_hw=inv_hw, hw=HW, hw_tile=hw_tile,
            mask_tail=(HW % hw_tile != 0))
        grid_spec = pltpu.PrefetchScalarGridSpec(
            num_scalar_prefetch=0,
            grid=grid,
            in_specs=[pl.BlockSpec((b_blk, C, hw_tile), lambda b, k: (b, 0, k))],
            out_specs=pl.BlockSpec((b_blk, C), lambda b, k: (b, 0)),
            scratch_shapes=[pltpu.VMEM((b_blk, C), jnp.float32)],
        )
        dim_sem = ("parallel", "arbitrary")

    # >= 32 MiB overrides v5e's 16 MiB scoped default; <= 48 MiB stays well
    # inside v7x's 64 MiB physical VMEM.
    vmem_limit = int(min(48 * 1024 * 1024, max(32 * 1024 * 1024, need)))

    return pl.pallas_call(
        kernel,
        out_shape=jax.ShapeDtypeStruct((B, C), x.dtype),
        grid_spec=grid_spec,
        compiler_params=pltpu.CompilerParams(
            dimension_semantics=dim_sem,
            vmem_limit_bytes=vmem_limit,
        ),
    )(x_flat)


if __name__ == "__main__":
    key = jax.random.PRNGKey(0)

    # 1) Primary check: small shape consistent with the module (direct path).
    B, C, H, W = 2, 4, 16, 16
    x = jax.random.normal(key, (B, C, H, W), dtype=jnp.float32)
    y = global_avg_pool_2d(x)
    jax.block_until_ready(y)
    y_ref = jnp.mean(x, axis=(2, 3))
    assert y.shape == (B, C), y.shape
    assert jnp.allclose(y, y_ref, atol=1e-5, rtol=1e-5), "direct path mismatch"

    # 2) Fallback path: tiny VMEM target forces HW tiling with an accumulator,
    #    a masked spatial tail (576 % 128 != 0) and a partial batch tail.
    key2 = jax.random.PRNGKey(0)
    B2, C2, H2, W2 = 10, 8, 24, 24
    x2 = jax.random.normal(key2, (B2, C2, H2, W2), dtype=jnp.float32)
    y2 = global_avg_pool_2d(x2, vmem_target_bytes=8 * 1024)
    jax.block_until_ready(y2)
    y2_ref = jnp.mean(x2, axis=(2, 3))
    assert y2.shape == (B2, C2), y2.shape
    assert jnp.allclose(y2, y2_ref, atol=1e-5, rtol=1e-5), "tiled path mismatch"

    # 3) Direct path with a multi-block, non-divisible batch grid (boundary
    #    block handled without any wrapper-side padding).
    key3 = jax.random.PRNGKey(0)
    B3, C3, H3, W3 = 20, 4, 4, 4
    x3 = jax.random.normal(key3, (B3, C3, H3, W3), dtype=jnp.float32)
    y3 = global_avg_pool_2d(x3)
    jax.block_until_ready(y3)
    y3_ref = jnp.mean(x3, axis=(2, 3))
    assert y3.shape == (B3, C3), y3.shape
    assert jnp.allclose(y3, y3_ref, atol=1e-5, rtol=1e-5), "batch-tail mismatch"

    print("KERNEL_OK")
</pallas_src>

<mosaic_0001>
module attributes {stable_mosaic.version = 11 : i64} {
  func.func @_gap_direct_kernel(%arg0: i32, %arg1: i32, %arg2: memref<2x4x256xf32, #tpu.memory_space<vmem>>, %arg3: memref<2x4xf32, #tpu.memory_space<vmem>>) attributes {dimension_semantics = [#tpu.dimension_semantics<parallel>, #tpu.dimension_semantics<parallel>], iteration_bounds = array<i64: 1, 1>, scalar_prefetch = 0 : i64, scratch_operands = 0 : i64, tpu.core_type = #tpu.core_type<tc>, window_params = [{transform_indices = @transform_0, window_bounds = array<i64: 2, 4, 256>}, {transform_indices = @transform_1, window_bounds = array<i64: 2, 4>}]} {
    %c0 = arith.constant 0 : index
    %c0_0 = arith.constant 0 : index
    %c0_1 = arith.constant 0 : index
    %0 = vector.load %arg2[%c0, %c0_0, %c0_1] : memref<2x4x256xf32, #tpu.memory_space<vmem>>, vector<2x4x256xf32>
    %cst = arith.constant dense<0.000000e+00> : vector<2x4xf32>
    %1 = vector.multi_reduction <add>, %0, %cst [2] : vector<2x4x256xf32> to vector<2x4xf32>
    %cst_2 = arith.constant 3.906250e-03 : f32
    %2 = vector.broadcast %cst_2 : f32 to vector<2x4xf32>
    %3 = arith.mulf %1, %2 : vector<2x4xf32>
    %c0_3 = arith.constant 0 : index
    %c0_4 = arith.constant 0 : index
    %4 = vector.load %arg3[%c0_3, %c0_4] : memref<2x4xf32, #tpu.memory_space<vmem>>, vector<2x4xf32>
    tpu.vector_store %arg3[%c0_3, %c0_4], %3 {strides = array<i32>} : memref<2x4xf32, #tpu.memory_space<vmem>>, vector<2x4xf32>,
    return
  }
  func.func @transform_0(%arg0: i32, %arg1: i32) -> (i32, i32, i32) {
    %c0_i32 = arith.constant 0 : i32
    %c0_i32_0 = arith.constant 0 : i32
    return %arg0, %arg1, %c0_i32 : i32, i32, i32
  }
  func.func @transform_1(%arg0: i32, %arg1: i32) -> (i32, i32) {
    %c0_i32 = arith.constant 0 : i32
    return %arg0, %arg1 : i32, i32
  }
}

</mosaic_0001>

<bundles_post_ra>
// kernel: tpu_custom_call.1
= control target key start
LH: loop header
LB: loop body
LE: loop exit
PB: predicated region body
PF: predicated region fallthrough
CT: control target
= control target key end

     0   :  { %6 = vsyncpa [#allocation3], 0  ;;  %s146_s0 = inlined_call_operand.hbm [shape: f32[2,4,256], index: 0, kind: input, shape index: {}]   ;;  %s147_s1 = inlined_call_operand.hbm [shape: f32[2,4], index: 1, kind: output, shape index: {}]  }
   0x1   :  { %7 = vsyncpa [#allocation4], 0  ;;  %s126_s6 = smov [#allocation2]  }
   0x2   :  { %s13_s7 = sshll.u32 %s126_s6, 4  ;;  %s14_s7 = int_to_ptr.vmem [resolvable:$true] %s13_s7 }
   0x3   :  { %s90_s8 = scalar_lea.vmem %s14_s7, 256  ;;  %p95_p1 = scmp.lt.s32.totalorder %s14_s7, %s14_s7 }
   0x4   :  { %p91_p0 = scmp.ne.s32.totalorder %s14_s7, %s90_s8  ;;  %p96_p2 = scmp.lt.s32.totalorder %s90_s8, %s90_s8 }
   0x6   :  { %p97_p3 = por %p96_p2, %p95_p1 }
   0x8   :  { %p98_p4 = pnand %p97_p3, %p91_p0 }
   0xa   :  { %101 = shalt.err (!%p98_p4)
}
   0xb   :  { %s127_s9 = smov 128   ;;  %s128_s10 = smov 8  }
   0xc   :  { %19 = dma.hbm_to_vmem [thread:$0]  %s146_s0, 256, %s14_s7, [#allocation3], %s127_s9, %s127_s9, %s128_s10  }
   0xd   :  { %122 = dma.done.wait [#allocation3], 256  }
   0xe   :  { %123 = vsyncadd [#allocation3], 4294967040  ;;  %vm31_vm0 = vcmask 1043456   ;;  %v23_v0 = vld [vmem:[#allocation2] sm:$0xff]  ;;  %v24_v1 = vld [vmem:[#allocation2 + $0x8] sm:$0xff]  ;;  %v46_v10 = vlaneseq  ;;  %s129_s0 = smov [#allocation5]  }
   0xf   :  { %v27_v2 = vcombine.high %v23_v0, %v23_v0  ;;  %v32_v3 = vsel %vm31_vm0, %v23_v0, 0.0  ;;  %v28_v4 = vcombine.high %v24_v1, %v24_v1  ;;  %v37_v6 = vsel %vm31_vm0, %v24_v1, 0.0  ;;  %s67_s13 = sshll.u32 %s129_s0, 4  ;;  %s68_s13 = int_to_ptr.vmem [resolvable:$true] %s67_s13 }
  0x10   :  { %v47_v11 = vand.u32 127, %v46_v10  ;;  %v49_v12 = vshrl.u32 %v46_v10, 7  ;;  %vm56_vm1 = vcmask 1041409   ;;  %vm59_vm2 = vcmask 25600   ;;  %s102_s14 = scalar_lea.vmem %s68_s13, 32  ;;  %p107_p6 = scmp.lt.s32.totalorder %s68_s13, %s68_s13 }
  0x11   :  { %v33_v5 = vsel %vm31_vm0, %v27_v2, 0.0  ;;  %v38_v7 = vsel %vm31_vm0, %v28_v4, 0.0  ;;  %p103_p5 = scmp.ne.s32.totalorder %s68_s13, %s102_s14  ;;  %p108_p7 = scmp.lt.s32.totalorder %s102_s14, %s102_s14 }
  0x12   :  { %v34_v8 = vadd.f32 %v33_v5, %v32_v3  ;;  %v39_v9 = vadd.f32 %v38_v7, %v37_v6  ;;  %v50_v14 = vsub.s32 %v47_v11, %v49_v12 }
  0x13   :  { %p109_p8 = por %p108_p7, %p107_p6 }
  0x14   :  { %35 = vadd.xlane.f32.xlu0 %v34_v8 }
  0x15   :  { %p110_p9 = pnand %p109_p8, %p103_p5 }
  0x18   :  { %40 = vadd.xlane.f32.xlu0 %v39_v9 }
  0x9d   :  { %v36_v13 = vpop.xlane.xlu0 %35 }
  0x9e   :  { %v42_v15 = vmul.f32 0.00390625, %v36_v13 }
  0xa0   :  { %v51_v18 = vrot.slane %v42_v15, %v50_v14 }
  0xa1   :  { %v41_v16 = vpop.xlane.xlu0 %40 }
  0xa2   :  { %v43_v17 = vmul.f32 0.00390625, %v41_v16 }
  0xa4   :  { %v55_v19 = vrot.slane %v43_v17, %v50_v14 }
  0xa6   :  { %v57_v20 = vsel %vm56_vm1, %v55_v19, %v51_v18 }
  0xa7   :  { %60 = vst.msk [vmem:[#allocation5] sm:$0x3] %vm59_vm2, %v57_v20 }
  0xa8   :  { %113 = shalt.err (!%p110_p9)
}
  0xa9   :  { %70 = dma.vmem_to_hbm [thread:$0]  %s68_s13, 32, %s147_s1, [#allocation4]  }
  0xaa   :  { %124 = dma.done.wait [#allocation4], 32  }
  0xab   :  { %125 = vsyncadd [#allocation4], 4294967264 }
  0xac   :  { %74 = vsyncpa [#allocation3], 1 }
  0xad   :  { %75 = vsyncpa [#allocation4], 1 }

</bundles_post_ra>
